<compile_context>
chip_gen: v7x
topology: tpu7x:2x2x1
jax: 0.10.0
libtpu: 0.0.40
codegen_flags: <defaults>
</compile_context>

<pallas_src>
import numpy as np
import jax
import jax.numpy as jnp
from jax.experimental import pallas as pl
from jax.experimental.pallas import tpu as pltpu

LN_EPS = 1e-5  # torch.nn.LayerNorm default


# ----------------------------- kernel math ---------------------------------
def _gelu_exact(x):
    # torch.nn.functional.gelu default = exact (erf) formulation, in f32.
    return 0.5 * x * (1.0 + jax.lax.erf(x * 0.7071067811865476))


def _projection_math(x_bf16, w1, w2, gamma, beta):
    """Projection: linear1 -> gelu -> linear2 -> residual -> LayerNorm.

    Matches the PyTorch Projection module: both linears are bias-free
    (nn.Linear(..., bias=False)); nn.Dropout(p=0.5) is identity at inference.
    x / w1 / w2 are bf16 (MXU-native); accumulation + LN epilogue are f32.
    Weights are pre-transposed to [d_in, d_out] so x @ w == torch's x @ W.T.
    """
    e1 = jnp.dot(x_bf16, w1, preferred_element_type=jnp.float32)          # f32 acc
    h = _gelu_exact(e1).astype(jnp.bfloat16)
    e2 = jnp.dot(h, w2, preferred_element_type=jnp.float32)               # f32 acc
    s = e1 + e2
    # single-pass LayerNorm statistics: var = E[x^2] - mu^2
    mu = jnp.mean(s, axis=-1, keepdims=True)
    ms = jnp.mean(s * s, axis=-1, keepdims=True)
    var = ms - mu * mu
    return (s - mu) * jax.lax.rsqrt(var + LN_EPS) * gamma + beta


# ------------------------------ Pallas kernel --------------------------------
def clap_heads_kernel(audio_ref, wstub_ref, aw1_ref, aw2_ref, ag_ref, ab_ref,
                      pooled_ref, tw1_ref, tw2_ref, tg_ref, tb_ref,
                      audio_out_ref, text_out_ref):
    # ---- audio branch: HTSAT-stub matmul fused in ----
    feat = jnp.dot(audio_ref[...], wstub_ref[...],
                   preferred_element_type=jnp.float32).astype(jnp.bfloat16)
    audio_out_ref[...] = _projection_math(
        feat, aw1_ref[...], aw2_ref[...], ag_ref[...], ab_ref[...]
    ).astype(audio_out_ref.dtype)

    # ---- text branch: CLIP text_projection already folded into tw1 ----
    text_out_ref[...] = _projection_math(
        pooled_ref[...], tw1_ref[...], tw2_ref[...], tg_ref[...], tb_ref[...]
    ).astype(text_out_ref.dtype)


def _round_up(x, m):
    return ((x + m - 1) // m) * m


def clap_heads(params, audio, pooled, *, out_dtype=jnp.bfloat16):
    """One fused pallas_call producing (audio_embed, caption_embed)."""
    B = audio.shape[0]
    audio_len = audio.shape[1]
    d_in = params["w_htsat_stub"].shape[1]
    d_text = pooled.shape[1]
    d_proj = params["a_w1"].shape[1]

    # bf16 native vreg tile is (16, 128): pad batch to a multiple of 16.
    MB = _round_up(max(B, 16), 16)
    TM = MB if MB <= 256 else 256          # >=256 rows/step once batch grows
    MB = _round_up(MB, TM)
    n_tiles = MB // TM

    audio_p = jnp.pad(audio.astype(jnp.bfloat16), ((0, MB - B), (0, 0)))
    pooled_p = jnp.pad(pooled.astype(jnp.bfloat16), ((0, MB - B), (0, 0)))

    inputs = (audio_p, params["w_htsat_stub"],
              params["a_w1"], params["a_w2"], params["a_gamma"], params["a_beta"],
              pooled_p, params["t_w1_fold"],
              params["t_w2"], params["t_gamma"], params["t_beta"])

    def batch_spec(shape):
        return pl.BlockSpec(shape, lambda i: (i, 0))

    def fixed_spec(shape):
        return pl.BlockSpec(shape, lambda i: (0, 0))

    in_specs = [
        batch_spec((TM, audio_len)),          # audio (batch-tiled)
        fixed_spec((audio_len, d_in)),        # HTSAT stub weight (resident)
        fixed_spec((d_in, d_proj)),           # audio proj linear1
        fixed_spec((d_proj, d_proj)),         # audio proj linear2
        fixed_spec((1, d_proj)),              # audio LN gamma
        fixed_spec((1, d_proj)),              # audio LN beta
        batch_spec((TM, d_text)),             # pooled text (batch-tiled)
        fixed_spec((d_text, d_proj)),         # folded (clip_proj @ linear1)
        fixed_spec((d_proj, d_proj)),         # text proj linear2
        fixed_spec((1, d_proj)),              # text LN gamma
        fixed_spec((1, d_proj)),              # text LN beta
    ]
    out_specs = (batch_spec((TM, d_proj)), batch_spec((TM, d_proj)))
    out_shape = (jax.ShapeDtypeStruct((MB, d_proj), out_dtype),
                 jax.ShapeDtypeStruct((MB, d_proj), out_dtype))

    # Real VMEM footprint (batch-tiled buffers double-buffered) + headroom,
    # capped well below v7x's 64 MiB per-TC physical VMEM.
    def _bytes(shape, dt):
        return int(np.prod(shape)) * jnp.dtype(dt).itemsize

    out_isize = jnp.dtype(out_dtype).itemsize
    block_bytes = (
        2 * _bytes((TM, audio_len), jnp.bfloat16)
        + 2 * _bytes((TM, d_text), jnp.bfloat16)
        + _bytes((audio_len, d_in), jnp.bfloat16)
        + _bytes((d_in, d_proj), jnp.bfloat16)
        + 2 * _bytes((d_proj, d_proj), jnp.bfloat16)
        + _bytes((d_text, d_proj), jnp.bfloat16)
        + 4 * _bytes((1, d_proj), jnp.float32)
        + 2 * 2 * TM * d_proj * out_isize
    )
    vmem_limit = int(min(48 << 20, max(8 << 20, 2 * block_bytes)))

    flops = 2 * MB * (audio_len * d_in + d_in * d_proj + d_proj * d_proj
                      + d_text * d_proj + d_proj * d_proj)
    transcendentals = 2 * MB * d_proj         # erf per element of e1, both heads
    bytes_accessed = int(sum(_bytes(x.shape, x.dtype) for x in inputs)
                         + 2 * MB * d_proj * out_isize)

    audio_out, text_out = pl.pallas_call(
        clap_heads_kernel,
        out_shape=out_shape,
        grid=(n_tiles,),
        in_specs=in_specs,
        out_specs=out_specs,
        compiler_params=pltpu.CompilerParams(
            dimension_semantics=("parallel",),
            vmem_limit_bytes=vmem_limit),
        cost_estimate=pl.CostEstimate(flops=flops,
                                      transcendentals=transcendentals,
                                      bytes_accessed=bytes_accessed),
    )(*inputs)
    return audio_out[:B], text_out[:B]


# ------------------------------ CLAP (forward) ------------------------------
def init_params(key, audio_len, d_in, d_text, d_proj):
    ks = jax.random.split(key, 6)
    scale = 0.02
    bf = jnp.bfloat16
    return {
        # TODO(synk): stand-in for HTSAT backbone (waveform -> d_in embedding).
        "w_htsat_stub": (scale * jax.random.normal(ks[0], (audio_len, d_in))).astype(bf),
        # audio Projection(d_in, d_proj): bias-free linears per the spec
        "a_w1": (scale * jax.random.normal(ks[1], (d_in, d_proj))).astype(bf),
        "a_w2": (scale * jax.random.normal(ks[2], (d_proj, d_proj))).astype(bf),
        "a_gamma": jnp.ones((1, d_proj), jnp.float32),
        "a_beta": jnp.zeros((1, d_proj), jnp.float32),
        # CLIP text_projection (bias-free)
        "w_clip_proj": (scale * jax.random.normal(ks[3], (d_text, d_text))).astype(bf),
        # text Projection(d_text, d_proj)
        "t_w1": (scale * jax.random.normal(ks[4], (d_text, d_proj))).astype(bf),
        "t_w2": (scale * jax.random.normal(ks[5], (d_proj, d_proj))).astype(bf),
        "t_gamma": jnp.ones((1, d_proj), jnp.float32),
        "t_beta": jnp.zeros((1, d_proj), jnp.float32),
        "logit_scale": jnp.asarray(np.log(1.0 / 0.07), jnp.float32),
    }


def prepare_params(params):
    """Inference-time param prep: fold the bias-free CLIP text_projection into
    the text head's first (bias-free) linear: x @ Wc @ W1 == x @ (Wc @ W1)."""
    p = dict(params)
    p["t_w1_fold"] = jnp.dot(params["w_clip_proj"].astype(jnp.float32),
                             params["t_w1"].astype(jnp.float32)).astype(jnp.bfloat16)
    return p


def clap_forward(params, audio, text_hidden):
    """Mirrors CLAP.forward(audio, text) -> (caption_embed, audio_embed, scale)."""
    # TODO(synk): CLIP text transformer not reimplemented; pooled output is
    # taken as the last-token hidden state (EOS pooling analogue).
    pooled = text_hidden[:, -1, :]
    audio_embed, caption_embed = clap_heads(params, audio, pooled)
    return caption_embed, audio_embed, jnp.exp(params["logit_scale"])


# ------------------------------ reference (JAX) -----------------------------
def clap_forward_ref(params, audio, text_hidden):
    feat = jnp.dot(audio.astype(jnp.bfloat16), params["w_htsat_stub"],
                   preferred_element_type=jnp.float32).astype(jnp.bfloat16)
    audio_embed = _projection_math(feat, params["a_w1"], params["a_w2"],
                                   params["a_gamma"], params["a_beta"])
    pooled = text_hidden[:, -1, :].astype(jnp.bfloat16)
    caption_embed = _projection_math(pooled, params["t_w1_fold"], params["t_w2"],
                                     params["t_gamma"], params["t_beta"])
    return caption_embed, audio_embed, jnp.exp(params["logit_scale"])


# ---------------------------------- main ------------------------------------
if __name__ == "__main__":
    B = 2             # batch
    AUDIO_LEN = 1024  # (small) raw waveform length
    SEQ = 8           # text sequence length
    D_IN = 256        # out_emb               (scaled down from 768)
    D_TEXT = 128      # transformer_embed_dim (scaled down from 512)
    D_PROJ = 128      # d_proj                (scaled down from 1024)

    root = jax.random.PRNGKey(0)
    k_params, k_audio, k_text = jax.random.split(root, 3)

    params = prepare_params(init_params(k_params, AUDIO_LEN, D_IN, D_TEXT, D_PROJ))
    audio = jax.random.normal(k_audio, (B, AUDIO_LEN), jnp.float32)
    text_hidden = jax.random.normal(k_text, (B, SEQ, D_TEXT), jnp.float32)

    fwd = jax.jit(clap_forward)
    caption_embed, audio_embed, logit_scale = jax.block_until_ready(
        fwd(params, audio, text_hidden))

    # correctness check against a pure-JAX reference using identical bf16 math
    # (kernel outputs are bf16; compare in f32 with bf16-rounding tolerance)
    ref_cap, ref_aud, ref_scale = clap_forward_ref(params, audio, text_hidden)
    np.testing.assert_allclose(np.asarray(caption_embed, dtype=np.float32),
                               np.asarray(ref_cap, dtype=np.float32),
                               rtol=2e-2, atol=2e-2)
    np.testing.assert_allclose(np.asarray(audio_embed, dtype=np.float32),
                               np.asarray(ref_aud, dtype=np.float32),
                               rtol=2e-2, atol=2e-2)
    np.testing.assert_allclose(float(logit_scale), float(ref_scale), rtol=1e-6)

    assert caption_embed.shape == (B, D_PROJ)
    assert audio_embed.shape == (B, D_PROJ)
    print("KERNEL_OK")
</pallas_src>

<mosaic_0001>
module attributes {stable_mosaic.version = 11 : i64} {
  func.func @clap_heads_kernel(%arg0: i32, %arg1: memref<16x1024xbf16, #tpu.memory_space<vmem>>, %arg2: memref<1024x256xbf16, #tpu.memory_space<vmem>>, %arg3: memref<256x128xbf16, #tpu.memory_space<vmem>>, %arg4: memref<128x128xbf16, #tpu.memory_space<vmem>>, %arg5: memref<1x128xf32, #tpu.memory_space<vmem>>, %arg6: memref<1x128xf32, #tpu.memory_space<vmem>>, %arg7: memref<16x128xbf16, #tpu.memory_space<vmem>>, %arg8: memref<128x128xbf16, #tpu.memory_space<vmem>>, %arg9: memref<128x128xbf16, #tpu.memory_space<vmem>>, %arg10: memref<1x128xf32, #tpu.memory_space<vmem>>, %arg11: memref<1x128xf32, #tpu.memory_space<vmem>>, %arg12: memref<16x128xbf16, #tpu.memory_space<vmem>>, %arg13: memref<16x128xbf16, #tpu.memory_space<vmem>>) attributes {dimension_semantics = [#tpu.dimension_semantics<parallel>], iteration_bounds = array<i64: 1>, scalar_prefetch = 0 : i64, scratch_operands = 0 : i64, tpu.core_type = #tpu.core_type<tc>, window_params = [{transform_indices = @transform_0, window_bounds = array<i64: 16, 1024>}, {pipeline_mode = #tpu.pipeline_mode<synchronous>, transform_indices = @transform_1, window_bounds = array<i64: 1024, 256>}, {pipeline_mode = #tpu.pipeline_mode<synchronous>, transform_indices = @transform_2, window_bounds = array<i64: 256, 128>}, {pipeline_mode = #tpu.pipeline_mode<synchronous>, transform_indices = @transform_3, window_bounds = array<i64: 128, 128>}, {pipeline_mode = #tpu.pipeline_mode<synchronous>, transform_indices = @transform_4, window_bounds = array<i64: 1, 128>}, {pipeline_mode = #tpu.pipeline_mode<synchronous>, transform_indices = @transform_5, window_bounds = array<i64: 1, 128>}, {transform_indices = @transform_6, window_bounds = array<i64: 16, 128>}, {pipeline_mode = #tpu.pipeline_mode<synchronous>, transform_indices = @transform_7, window_bounds = array<i64: 128, 128>}, {pipeline_mode = #tpu.pipeline_mode<synchronous>, transform_indices = @transform_8, window_bounds = array<i64: 128, 128>}, {pipeline_mode = #tpu.pipeline_mode<synchronous>, transform_indices = @transform_9, window_bounds = array<i64: 1, 128>}, {pipeline_mode = #tpu.pipeline_mode<synchronous>, transform_indices = @transform_10, window_bounds = array<i64: 1, 128>}, {transform_indices = @transform_11, window_bounds = array<i64: 16, 128>}, {transform_indices = @transform_12, window_bounds = array<i64: 16, 128>}]} {
    %c0 = arith.constant 0 : index
    %c0_0 = arith.constant 0 : index
    %0 = vector.load %arg1[%c0, %c0_0] : memref<16x1024xbf16, #tpu.memory_space<vmem>>, vector<16x1024xbf16>
    %c0_1 = arith.constant 0 : index
    %c0_2 = arith.constant 0 : index
    %1 = vector.load %arg2[%c0_1, %c0_2] : memref<1024x256xbf16, #tpu.memory_space<vmem>>, vector<1024x256xbf16>
    %cst = arith.constant dense<0.000000e+00> : vector<16x256xf32>
    %2 = tpu.matmul %0, %1, %cst {dimension_numbers = #tpu.dot_dimension_numbers<[1], [0], [0], [1], [0, 0, 1, 1], [], []>} : vector<16x1024xbf16>, vector<1024x256xbf16>, vector<16x256xf32> -> vector<16x256xf32>
    %3 = arith.truncf %2 : vector<16x256xf32> to vector<16x256xbf16>
    %c0_3 = arith.constant 0 : index
    %c0_4 = arith.constant 0 : index
    %4 = vector.load %arg3[%c0_3, %c0_4] : memref<256x128xbf16, #tpu.memory_space<vmem>>, vector<256x128xbf16>
    %c0_5 = arith.constant 0 : index
    %c0_6 = arith.constant 0 : index
    %5 = vector.load %arg4[%c0_5, %c0_6] : memref<128x128xbf16, #tpu.memory_space<vmem>>, vector<128x128xbf16>
    %c0_7 = arith.constant 0 : index
    %c0_8 = arith.constant 0 : index
    %6 = vector.load %arg5[%c0_7, %c0_8] : memref<1x128xf32, #tpu.memory_space<vmem>>, vector<1x128xf32>
    %c0_9 = arith.constant 0 : index
    %c0_10 = arith.constant 0 : index
    %7 = vector.load %arg6[%c0_9, %c0_10] : memref<1x128xf32, #tpu.memory_space<vmem>>, vector<1x128xf32>
    %cst_11 = arith.constant dense<0.000000e+00> : vector<16x128xf32>
    %8 = tpu.matmul %3, %4, %cst_11 {dimension_numbers = #tpu.dot_dimension_numbers<[1], [0], [0], [1], [0, 0, 1, 1], [], []>} : vector<16x256xbf16>, vector<256x128xbf16>, vector<16x128xf32> -> vector<16x128xf32>
    %cst_12 = arith.constant 5.000000e-01 : f32
    %9 = vector.broadcast %cst_12 : f32 to vector<16x128xf32>
    %10 = arith.mulf %9, %8 : vector<16x128xf32>
    %cst_13 = arith.constant 0.707106769 : f32
    %11 = vector.broadcast %cst_13 : f32 to vector<16x128xf32>
    %12 = arith.mulf %8, %11 : vector<16x128xf32>
    %13 = math.erf %12 : vector<16x128xf32>
    %cst_14 = arith.constant 1.000000e+00 : f32
    %14 = vector.broadcast %cst_14 : f32 to vector<16x128xf32>
    %15 = arith.addf %14, %13 : vector<16x128xf32>
    %16 = arith.mulf %10, %15 : vector<16x128xf32>
    %17 = arith.truncf %16 : vector<16x128xf32> to vector<16x128xbf16>
    %cst_15 = arith.constant dense<0.000000e+00> : vector<16x128xf32>
    %18 = tpu.matmul %17, %5, %cst_15 {dimension_numbers = #tpu.dot_dimension_numbers<[1], [0], [0], [1], [0, 0, 1, 1], [], []>} : vector<16x128xbf16>, vector<128x128xbf16>, vector<16x128xf32> -> vector<16x128xf32>
    %19 = arith.addf %8, %18 : vector<16x128xf32>
    %cst_16 = arith.constant dense<0.000000e+00> : vector<16xf32>
    %20 = vector.multi_reduction <add>, %19, %cst_16 [1] : vector<16x128xf32> to vector<16xf32>
    %21 = vector.shape_cast %20 : vector<16xf32> to vector<16x1xf32>
    %cst_17 = arith.constant 1.280000e+02 : f32
    %22 = vector.broadcast %cst_17 : f32 to vector<16x1xf32>
    %23 = arith.divf %21, %22 : vector<16x1xf32>
    %24 = arith.mulf %19, %19 : vector<16x128xf32>
    %cst_18 = arith.constant dense<0.000000e+00> : vector<16xf32>
    %25 = vector.multi_reduction <add>, %24, %cst_18 [1] : vector<16x128xf32> to vector<16xf32>
    %26 = vector.shape_cast %25 : vector<16xf32> to vector<16x1xf32>
    %cst_19 = arith.constant 1.280000e+02 : f32
    %27 = vector.broadcast %cst_19 : f32 to vector<16x1xf32>
    %28 = arith.divf %26, %27 : vector<16x1xf32>
    %29 = arith.mulf %23, %23 : vector<16x1xf32>
    %30 = arith.subf %28, %29 : vector<16x1xf32>
    %31 = vector.broadcast %23 : vector<16x1xf32> to vector<16x128xf32>
    %32 = arith.subf %19, %31 : vector<16x128xf32>
    %cst_20 = arith.constant 9.99999974E-6 : f32
    %33 = vector.broadcast %cst_20 : f32 to vector<16x1xf32>
    %34 = arith.addf %30, %33 : vector<16x1xf32>
    %35 = math.rsqrt %34 : vector<16x1xf32>
    %36 = vector.broadcast %35 : vector<16x1xf32> to vector<16x128xf32>
    %37 = arith.mulf %32, %36 : vector<16x128xf32>
    %38 = vector.broadcast %6 : vector<1x128xf32> to vector<16x128xf32>
    %39 = arith.mulf %37, %38 : vector<16x128xf32>
    %40 = vector.broadcast %7 : vector<1x128xf32> to vector<16x128xf32>
    %41 = arith.addf %39, %40 : vector<16x128xf32>
    %42 = arith.truncf %41 : vector<16x128xf32> to vector<16x128xbf16>
    %c0_21 = arith.constant 0 : index
    %c0_22 = arith.constant 0 : index
    %43 = vector.load %arg12[%c0_21, %c0_22] : memref<16x128xbf16, #tpu.memory_space<vmem>>, vector<16x128xbf16>
    tpu.vector_store %arg12[%c0_21, %c0_22], %42 {strides = array<i32>} : memref<16x128xbf16, #tpu.memory_space<vmem>>, vector<16x128xbf16>,
    %c0_23 = arith.constant 0 : index
    %c0_24 = arith.constant 0 : index
    %44 = vector.load %arg7[%c0_23, %c0_24] : memref<16x128xbf16, #tpu.memory_space<vmem>>, vector<16x128xbf16>
    %c0_25 = arith.constant 0 : index
    %c0_26 = arith.constant 0 : index
    %45 = vector.load %arg8[%c0_25, %c0_26] : memref<128x128xbf16, #tpu.memory_space<vmem>>, vector<128x128xbf16>
    %c0_27 = arith.constant 0 : index
    %c0_28 = arith.constant 0 : index
    %46 = vector.load %arg9[%c0_27, %c0_28] : memref<128x128xbf16, #tpu.memory_space<vmem>>, vector<128x128xbf16>
    %c0_29 = arith.constant 0 : index
    %c0_30 = arith.constant 0 : index
    %47 = vector.load %arg10[%c0_29, %c0_30] : memref<1x128xf32, #tpu.memory_space<vmem>>, vector<1x128xf32>
    %c0_31 = arith.constant 0 : index
    %c0_32 = arith.constant 0 : index
    %48 = vector.load %arg11[%c0_31, %c0_32] : memref<1x128xf32, #tpu.memory_space<vmem>>, vector<1x128xf32>
    %cst_33 = arith.constant dense<0.000000e+00> : vector<16x128xf32>
    %49 = tpu.matmul %44, %45, %cst_33 {dimension_numbers = #tpu.dot_dimension_numbers<[1], [0], [0], [1], [0, 0, 1, 1], [], []>} : vector<16x128xbf16>, vector<128x128xbf16>, vector<16x128xf32> -> vector<16x128xf32>
    %cst_34 = arith.constant 5.000000e-01 : f32
    %50 = vector.broadcast %cst_34 : f32 to vector<16x128xf32>
    %51 = arith.mulf %50, %49 : vector<16x128xf32>
    %cst_35 = arith.constant 0.707106769 : f32
    %52 = vector.broadcast %cst_35 : f32 to vector<16x128xf32>
    %53 = arith.mulf %49, %52 : vector<16x128xf32>
    %54 = math.erf %53 : vector<16x128xf32>
    %cst_36 = arith.constant 1.000000e+00 : f32
    %55 = vector.broadcast %cst_36 : f32 to vector<16x128xf32>
    %56 = arith.addf %55, %54 : vector<16x128xf32>
    %57 = arith.mulf %51, %56 : vector<16x128xf32>
    %58 = arith.truncf %57 : vector<16x128xf32> to vector<16x128xbf16>
    %cst_37 = arith.constant dense<0.000000e+00> : vector<16x128xf32>
    %59 = tpu.matmul %58, %46, %cst_37 {dimension_numbers = #tpu.dot_dimension_numbers<[1], [0], [0], [1], [0, 0, 1, 1], [], []>} : vector<16x128xbf16>, vector<128x128xbf16>, vector<16x128xf32> -> vector<16x128xf32>
    %60 = arith.addf %49, %59 : vector<16x128xf32>
    %cst_38 = arith.constant dense<0.000000e+00> : vector<16xf32>
    %61 = vector.multi_reduction <add>, %60, %cst_38 [1] : vector<16x128xf32> to vector<16xf32>
    %62 = vector.shape_cast %61 : vector<16xf32> to vector<16x1xf32>
    %cst_39 = arith.constant 1.280000e+02 : f32
    %63 = vector.broadcast %cst_39 : f32 to vector<16x1xf32>
    %64 = arith.divf %62, %63 : vector<16x1xf32>
    %65 = arith.mulf %60, %60 : vector<16x128xf32>
    %cst_40 = arith.constant dense<0.000000e+00> : vector<16xf32>
    %66 = vector.multi_reduction <add>, %65, %cst_40 [1] : vector<16x128xf32> to vector<16xf32>
    %67 = vector.shape_cast %66 : vector<16xf32> to vector<16x1xf32>
    %cst_41 = arith.constant 1.280000e+02 : f32
    %68 = vector.broadcast %cst_41 : f32 to vector<16x1xf32>
    %69 = arith.divf %67, %68 : vector<16x1xf32>
    %70 = arith.mulf %64, %64 : vector<16x1xf32>
    %71 = arith.subf %69, %70 : vector<16x1xf32>
    %72 = vector.broadcast %64 : vector<16x1xf32> to vector<16x128xf32>
    %73 = arith.subf %60, %72 : vector<16x128xf32>
    %cst_42 = arith.constant 9.99999974E-6 : f32
    %74 = vector.broadcast %cst_42 : f32 to vector<16x1xf32>
    %75 = arith.addf %71, %74 : vector<16x1xf32>
    %76 = math.rsqrt %75 : vector<16x1xf32>
    %77 = vector.broadcast %76 : vector<16x1xf32> to vector<16x128xf32>
    %78 = arith.mulf %73, %77 : vector<16x128xf32>
    %79 = vector.broadcast %47 : vector<1x128xf32> to vector<16x128xf32>
    %80 = arith.mulf %78, %79 : vector<16x128xf32>
    %81 = vector.broadcast %48 : vector<1x128xf32> to vector<16x128xf32>
    %82 = arith.addf %80, %81 : vector<16x128xf32>
    %83 = arith.truncf %82 : vector<16x128xf32> to vector<16x128xbf16>
    %c0_43 = arith.constant 0 : index
    %c0_44 = arith.constant 0 : index
    %84 = vector.load %arg13[%c0_43, %c0_44] : memref<16x128xbf16, #tpu.memory_space<vmem>>, vector<16x128xbf16>
    tpu.vector_store %arg13[%c0_43, %c0_44], %83 {strides = array<i32>} : memref<16x128xbf16, #tpu.memory_space<vmem>>, vector<16x128xbf16>,
    return
  }
  func.func @transform_0(%arg0: i32) -> (i32, i32) {
    %c0_i32 = arith.constant 0 : i32
    %c0_i32_0 = arith.constant 0 : i32
    return %arg0, %c0_i32 : i32, i32
  }
  func.func @transform_1(%arg0: i32) -> (i32, i32) {
    %c0_i32 = arith.constant 0 : i32
    %c0_i32_0 = arith.constant 0 : i32
    %c0_i32_1 = arith.constant 0 : i32
    return %c0_i32, %c0_i32_0 : i32, i32
  }
  func.func @transform_2(%arg0: i32) -> (i32, i32) {
    %c0_i32 = arith.constant 0 : i32
    %c0_i32_0 = arith.constant 0 : i32
    %c0_i32_1 = arith.constant 0 : i32
    return %c0_i32, %c0_i32_0 : i32, i32
  }
  func.func @transform_3(%arg0: i32) -> (i32, i32) {
    %c0_i32 = arith.constant 0 : i32
    %c0_i32_0 = arith.constant 0 : i32
    %c0_i32_1 = arith.constant 0 : i32
    return %c0_i32, %c0_i32_0 : i32, i32
  }
  func.func @transform_4(%arg0: i32) -> (i32, i32) {
    %c0_i32 = arith.constant 0 : i32
    %c0_i32_0 = arith.constant 0 : i32
    %c0_i32_1 = arith.constant 0 : i32
    return %c0_i32, %c0_i32_0 : i32, i32
  }
  func.func @transform_5(%arg0: i32) -> (i32, i32) {
    %c0_i32 = arith.constant 0 : i32
    %c0_i32_0 = arith.constant 0 : i32
    %c0_i32_1 = arith.constant 0 : i32
    return %c0_i32, %c0_i32_0 : i32, i32
  }
  func.func @transform_6(%arg0: i32) -> (i32, i32) {
    %c0_i32 = arith.constant 0 : i32
    %c0_i32_0 = arith.constant 0 : i32
    return %arg0, %c0_i32 : i32, i32
  }
  func.func @transform_7(%arg0: i32) -> (i32, i32) {
    %c0_i32 = arith.constant 0 : i32
    %c0_i32_0 = arith.constant 0 : i32
    %c0_i32_1 = arith.constant 0 : i32
    return %c0_i32, %c0_i32_0 : i32, i32
  }
  func.func @transform_8(%arg0: i32) -> (i32, i32) {
    %c0_i32 = arith.constant 0 : i32
    %c0_i32_0 = arith.constant 0 : i32
    %c0_i32_1 = arith.constant 0 : i32
    return %c0_i32, %c0_i32_0 : i32, i32
  }
  func.func @transform_9(%arg0: i32) -> (i32, i32) {
    %c0_i32 = arith.constant 0 : i32
    %c0_i32_0 = arith.constant 0 : i32
    %c0_i32_1 = arith.constant 0 : i32
    return %c0_i32, %c0_i32_0 : i32, i32
  }
  func.func @transform_10(%arg0: i32) -> (i32, i32) {
    %c0_i32 = arith.constant 0 : i32
    %c0_i32_0 = arith.constant 0 : i32
    %c0_i32_1 = arith.constant 0 : i32
    return %c0_i32, %c0_i32_0 : i32, i32
  }
  func.func @transform_11(%arg0: i32) -> (i32, i32) {
    %c0_i32 = arith.constant 0 : i32
    %c0_i32_0 = arith.constant 0 : i32
    return %arg0, %c0_i32 : i32, i32
  }
  func.func @transform_12(%arg0: i32) -> (i32, i32) {
    %c0_i32 = arith.constant 0 : i32
    %c0_i32_0 = arith.constant 0 : i32
    return %arg0, %c0_i32 : i32, i32
  }
}

</mosaic_0001>

<bundles_post_ra>
// kernel: clap_forward.1
= control target key start
LH: loop header
LB: loop body
LE: loop exit
PB: predicated region body
PF: predicated region fallthrough
CT: control target
= control target key end

     0   :  { %18 = vsyncpa [#allocation3], 0  ;;  %s2778_s0 = inlined_call_operand.vmem [shape: bf16[16,1024], index: 0, kind: input, shape index: {}]   ;;  %s2779_s1 = inlined_call_operand.hbm [shape: bf16[1024,256], index: 1, kind: input, shape index: {}]   ;;  %s2780_s2 = inlined_call_operand.vmem [shape: bf16[256,128], index: 2, kind: input, shape index: {}]   ;;  %s2781_s3 = inlined_call_operand.hbm [shape: bf16[128,128], index: 3, kind: input, shape index: {}]   ;;  %s2782_s4 = inlined_call_operand.vmem [shape: f32[1,128], index: 4, kind: input, shape index: {}]   ;;  %s2783_s5 = inlined_call_operand.vmem [shape: f32[1,128], index: 5, kind: input, shape index: {}]   ;;  %s2784_s6 = inlined_call_operand.vmem [shape: bf16[16,128], index: 6, kind: input, shape index: {}]   ;;  %s2785_s7 = inlined_call_operand.hbm [shape: bf16[128,128], index: 7, kind: input, shape index: {}]   ;;  %s2786_s8 = inlined_call_operand.hbm [shape: bf16[128,128], index: 8, kind: input, shape index: {}]   ;;  %s2787_s9 = inlined_call_operand.hbm [shape: f32[1,128], index: 9, kind: input, shape index: {}]   ;;  %s2788_s10 = inlined_call_operand.hbm [shape: f32[1,128], index: 10, kind: input, shape index: {}]   ;;  %s2789_s11 = inlined_call_operand.vmem [shape: bf16[16,128], index: 11, kind: output, shape index: {0}]   ;;  %s2790_s12 = inlined_call_operand.vmem [shape: bf16[16,128], index: 12, kind: output, shape index: {1}]  }
   0x1   :  { %19 = vsyncpa [#allocation5], 0 }
   0x2   :  { %20 = vsyncpa [#allocation8], 0 }
   0x3   :  { %21 = vsyncpa [#allocation11], 0  ;;  %s2469_s21 = smov [#allocation4]   ;;  %s2329_s25 = scalar_lea.hbm %s2781_s3, 1024 }
   0x4   :  { %s43_s22 = sshll.u32 %s2469_s21, 4  ;;  %p2330_p0 = scmp.ne.s32.totalorder %s2781_s3, %s2329_s25  ;;  %s44_s22 = int_to_ptr.vmem [resolvable:$true] %s43_s22 }
   0x5   :  { %p2333_p1 = scmp.lt.u32.totalorder %s2329_s25, %s2781_s3 }
   0x7   :  { %p2335_p2 = pnand %p2333_p1, %p2330_p0 }
   0x9   :  { %2338 = shalt.err (!%p2335_p2)
}
   0xa   :  { %s2339_s30 = scalar_lea.vmem %s44_s22, 1024  ;;  %p2344_p4 = scmp.lt.s32.totalorder %s44_s22, %s44_s22 }
   0xb   :  { %p2340_p3 = scmp.ne.s32.totalorder %s44_s22, %s2339_s30  ;;  %p2345_p5 = scmp.lt.s32.totalorder %s2339_s30, %s2339_s30 }
   0xd   :  { %p2346_p6 = por %p2345_p5, %p2344_p4 }
   0xf   :  { %p2347_p7 = pnand %p2346_p6, %p2340_p3 }
  0x11   :  { %2350 = shalt.err (!%p2347_p7)
}
  0x12   :  { %s2470_s13 = smov 64   ;;  %s2471_s14 = smov 4  }
  0x13   :  { %49 = dma.hbm_to_vmem [thread:$0]  %s2781_s3, 1024, %s44_s22, [#allocation5], %s2470_s13, %s2470_s13, %s2471_s14  }
  0x14   :  { %s2472_s17 = smov [#allocation7]   ;;  %s2473_s19 = smov [#allocation2]  }
  0x15   :  { %s73_s18 = sshll.u32 %s2472_s17, 4  ;;  %s29_s20 = sshll.u32 %s2473_s19, 4  ;;  %s74_s18 = int_to_ptr.vmem [resolvable:$true] %s73_s18  ;;  %s30_s20 = int_to_ptr.vmem [resolvable:$true] %s29_s20 }
  0x16   :  { %s2351_s24 = scalar_lea.hbm %s2786_s8, 1024 }
  0x17   :  { %p2352_p8 = scmp.ne.s32.totalorder %s2786_s8, %s2351_s24  ;;  %p2355_p9 = scmp.lt.u32.totalorder %s2351_s24, %s2786_s8 }
  0x19   :  { %p2357_p10 = pnand %p2355_p9, %p2352_p8 }
  0x1b   :  { %2360 = shalt.err (!%p2357_p10)
}
  0x1c   :  { %s2361_s3 = scalar_lea.vmem %s74_s18, 1024  ;;  %p2366_p12 = scmp.lt.s32.totalorder %s74_s18, %s74_s18 }
  0x1d   :  { %p2362_p11 = scmp.ne.s32.totalorder %s74_s18, %s2361_s3  ;;  %p2367_p13 = scmp.lt.s32.totalorder %s2361_s3, %s2361_s3 }
  0x1f   :  { %p2368_p0 = por %p2367_p13, %p2366_p12 }
  0x21   :  { %p2369_p1 = pnand %p2368_p0, %p2362_p11 }
  0x23   :  { %2372 = shalt.err (!%p2369_p1)
}
  0x24   :  { %79 = dma.hbm_to_vmem [thread:$0]  %s2786_s8, 1024, %s74_s18, [#allocation8], %s2470_s13, %s2470_s13, %s2471_s14  }
  0x25   :  { %s2373_s16 = scalar_lea.hbm %s2779_s1, 16384 }
  0x26   :  { %p2374_p2 = scmp.ne.s32.totalorder %s2779_s1, %s2373_s16  ;;  %p2377_p3 = scmp.lt.u32.totalorder %s2373_s16, %s2779_s1 }
  0x28   :  { %p2379_p4 = pnand %p2377_p3, %p2374_p2 }
  0x2a   :  { %2382 = shalt.err (!%p2379_p4)
}
  0x2b   :  { %s2383_s24 = scalar_lea.vmem %s30_s20, 16384  ;;  %p2388_p6 = scmp.lt.s32.totalorder %s30_s20, %s30_s20 }
  0x2c   :  { %p2384_p5 = scmp.ne.s32.totalorder %s30_s20, %s2383_s24  ;;  %p2389_p7 = scmp.lt.s32.totalorder %s2383_s24, %s2383_s24 }
  0x2e   :  { %p2390_p8 = por %p2389_p7, %p2388_p6 }
  0x30   :  { %p2391_p9 = pnand %p2390_p8, %p2384_p5 }
  0x32   :  { %2394 = shalt.err (!%p2391_p9)
}
  0x33   :  { %s2474_s8 = smov 128   ;;  %s2475_s18 = smov 8  }
  0x34   :  { %35 = dma.hbm_to_vmem [thread:$0]  %s2779_s1, 16384, %s30_s20, [#allocation3], %s2474_s8, %s2474_s8, %s2475_s18  }
  0x35   :  { %s2476_s27 = smov [#allocation6]   ;;  %s2477_s3 = smov [#allocation9]  }
  0x36   :  { %s61_s28 = sshll.u32 %s2476_s27, 4  ;;  %s86_s22 = sshll.u32 %s2477_s3, 4  ;;  %s62_s28 = int_to_ptr.vmem [resolvable:$true] %s61_s28  ;;  %s87_s22 = int_to_ptr.vmem [resolvable:$true] %s86_s22 }
  0x37   :  { %s2395_s15 = scalar_lea.hbm %s2785_s7, 1024 }
  0x38   :  { %p2396_p10 = scmp.ne.s32.totalorder %s2785_s7, %s2395_s15  ;;  %p2399_p11 = scmp.lt.u32.totalorder %s2395_s15, %s2785_s7 }
  0x3a   :  { %p2401_p12 = pnand %p2399_p11, %p2396_p10 }
  0x3c   :  { %2404 = shalt.err (!%p2401_p12)
}
  0x3d   :  { %s2405_s1 = scalar_lea.vmem %s62_s28, 1024  ;;  %p2410_p0 = scmp.lt.s32.totalorder %s62_s28, %s62_s28 }
  0x3e   :  { %p2406_p13 = scmp.ne.s32.totalorder %s62_s28, %s2405_s1  ;;  %p2411_p1 = scmp.lt.s32.totalorder %s2405_s1, %s2405_s1 }
  0x40   :  { %p2412_p2 = por %p2411_p1, %p2410_p0 }
  0x42   :  { %p2413_p3 = pnand %p2412_p2, %p2406_p13 }
  0x44   :  { %2416 = shalt.err (!%p2413_p3)
}
  0x45   :  { %67 = dma.hbm_to_vmem [thread:$0]  %s2785_s7, 1024, %s62_s28, [#allocation5], %s2470_s13, %s2470_s13, %s2471_s14  }
  0x46   :  { %s2417_s18 = scalar_lea.hbm %s2787_s9, 16 }
  0x47   :  { %p2418_p4 = scmp.ne.s32.totalorder %s2787_s9, %s2417_s18  ;;  %p2421_p5 = scmp.lt.u32.totalorder %s2417_s18, %s2787_s9 }
  0x49   :  { %p2423_p6 = pnand %p2421_p5, %p2418_p4 }
  0x4b   :  { %2426 = shalt.err (!%p2423_p6)
}
  0x4c   :  { %s2427_s29 = scalar_lea.vmem %s87_s22, 16  ;;  %s2431_s30 = scalar_lea.vmem %s87_s22, 32 }
  0x4d   :  { %p2428_p7 = scmp.ne.s32.totalorder %s87_s22, %s2427_s29  ;;  %p2432_p8 = scmp.lt.s32.totalorder %s87_s22, %s87_s22 }
  0x4e   :  { %p2433_p9 = scmp.lt.s32.totalorder %s2431_s30, %s2427_s29 }
  0x50   :  { %p2434_p10 = por %p2433_p9, %p2432_p8 }
  0x52   :  { %p2435_p11 = pnand %p2434_p10, %p2428_p7 }
  0x54   :  { %2438 = shalt.err (!%p2435_p11)
}
  0x55   :  { %89 = dma.hbm_to_vmem [thread:$0]  %s2787_s9, 16, %s87_s22, [#allocation8]  }
  0x56   :  { %s2478_s14 = smov [#allocation10]   ;;  %s2439_s17 = scalar_lea.hbm %s2788_s10, 16 }
  0x57   :  { %s96_s28 = sshll.u32 %s2478_s14, 4  ;;  %p2440_p12 = scmp.ne.s32.totalorder %s2788_s10, %s2439_s17  ;;  %s97_s28 = int_to_ptr.vmem [resolvable:$true] %s96_s28 }
  0x58   :  { %p2443_p13 = scmp.lt.u32.totalorder %s2439_s17, %s2788_s10 }
  0x5a   :  { %p2445_p0 = pnand %p2443_p13, %p2440_p12 }
  0x5c   :  { %2448 = shalt.err (!%p2445_p0)
}
  0x5d   :  { %s2449_s23 = scalar_lea.vmem %s97_s28, 16  ;;  %s2453_s9 = scalar_lea.vmem %s97_s28, 32 }
  0x5e   :  { %p2450_p1 = scmp.ne.s32.totalorder %s97_s28, %s2449_s23  ;;  %p2454_p2 = scmp.lt.s32.totalorder %s97_s28, %s97_s28 }
  0x5f   :  { %p2455_p3 = scmp.lt.s32.totalorder %s2453_s9, %s2449_s23 }
  0x61   :  { %p2456_p4 = por %p2455_p3, %p2454_p2 }
  0x63   :  { %p2457_p5 = pnand %p2456_p4, %p2450_p1 }
  0x65   :  { %2460 = shalt.err (!%p2457_p5)
}
  0x66   :  { %99 = dma.hbm_to_vmem [thread:$0]  %s2788_s10, 16, %s97_s28, [#allocation11]  }
  0x67   :  { %2461 = dma.done.wait [#allocation3], 16384  }
  0x68   :  { %2462 = vsyncadd [#allocation3], 4294950912 }
  0x69   :  { %2463 = dma.done.wait [#allocation5], 2048  }
  0x6a   :  { %2464 = vsyncadd [#allocation5], 4294965248 }
  0x6b   :  { %2465 = dma.done.wait [#allocation8], 1040  }
  0x6c   :  { %2466 = vsyncadd [#allocation8], 4294966256 }
  0x6d   :  { %2467 = dma.done.wait [#allocation11], 16  }
  0x6e   :  { %2468 = vsyncadd [#allocation11], 4294967280  ;;  %v2080_v0 = vld [vmem:[#allocation2 + $0x104] ss:$8 sps:$4 sm:$0xff]   ;;  %v2082_v1 = vld [vmem:[#allocation2 + $0x100] ss:$8 sps:$4 sm:$0xff]  }
  0x6f   :  { %978 = vmatprep.subr.bf16.mxu0 %v2080_v0  ;;  %v2083_v2 = vld [vmem:[#allocation2 + $0x114] ss:$8 sps:$4 sm:$0xff]   ;;  %v2085_v3 = vld [vmem:[#allocation2 + $0x110] ss:$8 sps:$4 sm:$0xff]   ;;  %v2086_v4 = vld [vmem:[#allocation2 + $0x124] ss:$8 sps:$4 sm:$0xff]  }
  0x70   :  { %979 = vmatpush1.bf16.msra.mxu0 %v2082_v1  ;;  %v2088_v5 = vld [vmem:[#allocation2 + $0x120] ss:$8 sps:$4 sm:$0xff]   ;;  %v2089_v6 = vld [vmem:[#allocation2 + $0x134] ss:$8 sps:$4 sm:$0xff]   ;;  %v2091_v7 = vld [vmem:[#allocation2 + $0x130] ss:$8 sps:$4 sm:$0xff]  }
  0x71   :  { %980 = vmatprep.subr.bf16.mxu0 %v2083_v2  ;;  %v2092_v8 = vld [vmem:[#allocation2 + $0x144] ss:$8 sps:$4 sm:$0xff]   ;;  %v2094_v9 = vld [vmem:[#allocation2 + $0x140] ss:$8 sps:$4 sm:$0xff]   ;;  %v2095_v10 = vld [vmem:[#allocation2 + $0x154] ss:$8 sps:$4 sm:$0xff]  }
  0x72   :  { %v2097_v11 = vld [vmem:[#allocation2 + $0x150] ss:$8 sps:$4 sm:$0xff]   ;;  %v2098_v12 = vld [vmem:[#allocation2 + $0x164] ss:$8 sps:$4 sm:$0xff]   ;;  %v2100_v16 = vld [vmem:[#allocation2 + $0x160] ss:$8 sps:$4 sm:$0xff]  }
  0x73   :  { %v2630_v13 = vld [vmem:[%s2778_s0 + $0x8] sm:$0xff]  ;;  %v2101_v17 = vld [vmem:[#allocation2 + $0x174] ss:$8 sps:$4 sm:$0xff]   ;;  %v2103_v18 = vld [vmem:[#allocation2 + $0x170] ss:$8 sps:$4 sm:$0xff]   ;;  %vm2480_vm0 = vmmov 0  }
  0x74   :  { %981 = vmatpush1.bf16.msra.mxu0 %v2085_v3  ;;  %v2635_v14 = vld [vmem:[%s2778_s0 + $0x28] sm:$0xff]  ;;  %v2107_v21 = vld [vmem:[#allocation2 + $0x194] ss:$8 sps:$4 sm:$0xff]   ;;  %v2109_v22 = vld [vmem:[#allocation2 + $0x190] ss:$8 sps:$4 sm:$0xff]  }
  0x75   :  { %982 = vmatprep.subr.bf16.mxu0 %v2086_v4  ;;  %v1751_v15 = vcombine.high %v2630_v13, %v2635_v14  ;;  %v2104_v19 = vld [vmem:[#allocation2 + $0x184] ss:$8 sps:$4 sm:$0xff]   ;;  %v2106_v20 = vld [vmem:[#allocation2 + $0x180] ss:$8 sps:$4 sm:$0xff]   ;;  %v2113_v25 = vld [vmem:[#allocation2 + $0x1b4] ss:$8 sps:$4 sm:$0xff]   ;;  %v1750_v49 = vcombine.low %v2630_v13, %v2635_v14 }
  0x76   :  { %v2110_v23 = vld [vmem:[#allocation2 + $0x1a4] ss:$8 sps:$4 sm:$0xff]   ;;  %v2112_v24 = vld [vmem:[#allocation2 + $0x1a0] ss:$8 sps:$4 sm:$0xff]   ;;  %v2115_v26 = vld [vmem:[#allocation2 + $0x1b0] ss:$8 sps:$4 sm:$0xff]  }
  0x77   :  { %1010 = vmatprep.mubr.bf16.mxu0 %v1751_v15  ;;  %v2116_v27 = vld [vmem:[#allocation2 + $0x1c4] ss:$8 sps:$4 sm:$0xff]   ;;  %v2178_v29 = vld [vmem:[#allocation2] ss:$8 sps:$4 sm:$0xff]   ;;  %v2182_v31 = vld [vmem:[#allocation2 + $0x14] ss:$8 sps:$4 sm:$0xff]  }
  0x78   :  { %983 = vmatpush1.bf16.msra.mxu0 %v2088_v5  ;;  %v2176_v28 = vld [vmem:[#allocation2 + $0x4] ss:$8 sps:$4 sm:$0xff]   ;;  %v2118_v30 = vld [vmem:[#allocation2 + $0x1c0] ss:$8 sps:$4 sm:$0xff]   ;;  %v2184_v32 = vld [vmem:[#allocation2 + $0x10] ss:$8 sps:$4 sm:$0xff]  }
  0x79   :  { %984 = vmatprep.subr.bf16.mxu0 %v2089_v6  ;;  %935 = vmatprep.subr.bf16.mxu1 %v2176_v28  ;;  %v2119_v33 = vld [vmem:[#allocation2 + $0x1d4] ss:$8 sps:$4 sm:$0xff]   ;;  %v2121_v34 = vld [vmem:[#allocation2 + $0x1d0] ss:$8 sps:$4 sm:$0xff]   ;;  %v2188_v35 = vld [vmem:[#allocation2 + $0x24] ss:$8 sps:$4 sm:$0xff]  }
  0x7a   :  { %936 = vmatpush1.bf16.msra.mxu1 %v2178_v29  ;;  %v2122_v36 = vld [vmem:[#allocation2 + $0x1e4] ss:$8 sps:$4 sm:$0xff]   ;;  %v2190_v37 = vld [vmem:[#allocation2 + $0x20] ss:$8 sps:$4 sm:$0xff]   ;;  %v2194_v38 = vld [vmem:[#allocation2 + $0x34] ss:$8 sps:$4 sm:$0xff]  }
  0x7b   :  { %937 = vmatprep.subr.bf16.mxu1 %v2182_v31  ;;  %v2124_v39 = vld [vmem:[#allocation2 + $0x1e0] ss:$8 sps:$4 sm:$0xff]   ;;  %v2125_v40 = vld [vmem:[#allocation2 + $0x1f4] ss:$8 sps:$4 sm:$0xff]   ;;  %v2196_v41 = vld [vmem:[#allocation2 + $0x30] ss:$8 sps:$4 sm:$0xff]  }
  0x7c   :  { %985 = vmatpush1.bf16.msra.mxu0 %v2091_v7  ;;  %v2200_v42 = vld [vmem:[#allocation2 + $0x44] ss:$8 sps:$4 sm:$0xff]   ;;  %v2127_v43 = vld [vmem:[#allocation2 + $0x1f0] ss:$8 sps:$4 sm:$0xff]   ;;  %v2202_v47 = vld [vmem:[#allocation2 + $0x40] ss:$8 sps:$4 sm:$0xff]  }
  0x7d   :  { %986 = vmatprep.subr.bf16.mxu0 %v2092_v8  ;;  %v2130_v44 = vld [vmem:[#allocation2 + $0x204] ss:$8 sps:$4 sm:$0xff]   ;;  %v2642_v45 = vld [vmem:[%s2778_s0 + $0x10] sm:$0xff]  ;;  %v2128_v50 = vld [vmem:[#allocation2 + $0x200] ss:$8 sps:$4 sm:$0xff]  }
  0x7e   :  { %938 = vmatpush1.bf16.msra.mxu1 %v2184_v32  ;;  %v2647_v46 = vld [vmem:[%s2778_s0 + $0x30] sm:$0xff]  ;;  %v2212_v54 = vld [vmem:[#allocation2 + $0x64] ss:$8 sps:$4 sm:$0xff]   ;;  %v2214_v57 = vld [vmem:[#allocation2 + $0x60] ss:$8 sps:$4 sm:$0xff]  }
  0x7f   :  { %939 = vmatprep.subr.bf16.mxu1 %v2188_v35  ;;  %v2206_v48 = vld [vmem:[#allocation2 + $0x54] ss:$8 sps:$4 sm:$0xff]   ;;  %v1753_v52 = vcombine.high %v2642_v45, %v2647_v46  ;;  %v2208_v53 = vld [vmem:[#allocation2 + $0x50] ss:$8 sps:$4 sm:$0xff]   ;;  %v2136_v56 = vld [vmem:[#allocation2 + $0x224] ss:$8 sps:$4 sm:$0xff]  }
  0x80   :  { %987 = vmatpush1.bf16.msra.mxu0 %v2094_v9  ;;  %v2133_v51 = vld [vmem:[#allocation2 + $0x214] ss:$8 sps:$4 sm:$0xff]   ;;  %v2131_v55 = vld [vmem:[#allocation2 + $0x210] ss:$8 sps:$4 sm:$0xff]   ;;  %v2134_v59 = vld [vmem:[#allocation2 + $0x220] ss:$8 sps:$4 sm:$0xff]  }
  0x81   :  { %988 = vmatprep.subr.bf16.mxu0 %v2095_v10  ;;  %v2218_v58 = vld [vmem:[#allocation2 + $0x74] ss:$8 sps:$4 sm:$0xff]   ;;  %v2220_v61 = vld [vmem:[#allocation2 + $0x70] ss:$8 sps:$4 sm:$0xff]   ;;  %v2224_v62 = vld [vmem:[#allocation2 + $0x84] ss:$8 sps:$4 sm:$0xff]  }
  0x82   :  { %940 = vmatpush1.bf16.msra.mxu1 %v2190_v37  ;;  %v2139_v60 = vld [vmem:[#allocation2 + $0x234] ss:$8 sps:$4 sm:$0xff]   ;;  %v2137_v63 = vld [vmem:[#allocation2 + $0x230] ss:$8 sps:$4 sm:$0xff]   ;;  %v2142_v0 = vld [vmem:[#allocation2 + $0x244] ss:$8 sps:$4 sm:$0xff]  }
  0x83   :  { %941 = vmatprep.subr.bf16.mxu1 %v2194_v38  ;;  %v2226_v1 = vld [vmem:[#allocation2 + $0x80] ss:$8 sps:$4 sm:$0xff]   ;;  %v2230_v2 = vld [vmem:[#allocation2 + $0x94] ss:$8 sps:$4 sm:$0xff]   ;;  %v2232_v5 = vld [vmem:[#allocation2 + $0x90] ss:$8 sps:$4 sm:$0xff]  }
  0x84   :  { %989 = vmatpush1.bf16.msra.mxu0 %v2097_v11  ;;  %v2140_v3 = vld [vmem:[#allocation2 + $0x240] ss:$8 sps:$4 sm:$0xff]   ;;  %v2145_v4 = vld [vmem:[#allocation2 + $0x254] ss:$8 sps:$4 sm:$0xff]   ;;  %v2236_v6 = vld [vmem:[#allocation2 + $0xa4] ss:$8 sps:$4 sm:$0xff]  }
  0x85   :  { %990 = vmatprep.subr.bf16.mxu0 %v2098_v12  ;;  %v2143_v7 = vld [vmem:[#allocation2 + $0x250] ss:$8 sps:$4 sm:$0xff]   ;;  %v2148_v8 = vld [vmem:[#allocation2 + $0x264] ss:$8 sps:$4 sm:$0xff]   ;;  %v2238_v9 = vld [vmem:[#allocation2 + $0xa0] ss:$8 sps:$4 sm:$0xff]  }
  0x86   :  { %942 = vmatpush1.bf16.msra.mxu1 %v2196_v41  ;;  %v2242_v10 = vld [vmem:[#allocation2 + $0xb4] ss:$8 sps:$4 sm:$0xff]   ;;  %v119_v11 = vld [vmem:[%s2778_s0] sm:$0xff]  ;;  %v2268_v32 = vld [vmem:[#allocation2 + $0xf0] ss:$8 sps:$4 sm:$0xff]  }
  0x87   :  { %943 = vmatprep.subr.bf16.mxu1 %v2200_v42  ;;  %v123_v12 = vld [vmem:[%s2778_s0 + $0x20] sm:$0xff]  ;;  %v2151_v15 = vld [vmem:[#allocation2 + $0x274] ss:$8 sps:$4 sm:$0xff]   ;;  %v2274_v38 = vld [vmem:[%s2780_s2 + $0x48] sm:$0xff]  }
  0x88   :  { %991 = vmatpush1.bf16.msra.mxu0 %v2100_v16  ;;  %v1749_v13 = vcombine.high %v119_v11, %v123_v12  ;;  %v2146_v14 = vld [vmem:[#allocation2 + $0x260] ss:$8 sps:$4 sm:$0xff]   ;;  %v2244_v16 = vld [vmem:[#allocation2 + $0xb0] ss:$8 sps:$4 sm:$0xff]   ;;  %v2266_v29 = vld [vmem:[#allocation2 + $0xf4] ss:$8 sps:$4 sm:$0xff]   ;;  %v1748_v37 = vcombine.low %v119_v11, %v123_v12 }
  0x89   :  { %992 = vmatprep.subr.bf16.mxu0 %v2101_v17  ;;  %v2248_v17 = vld [vmem:[#allocation2 + $0xc4] ss:$8 sps:$4 sm:$0xff]   ;;  %v2262_v28 = vld [vmem:[#allocation2 + $0xe0] ss:$8 sps:$4 sm:$0xff]   ;;  %v2163_v31 = vld [vmem:[#allocation2 + $0x2b4] ss:$8 sps:$4 sm:$0xff]  }
  0x8a   :  { %944 = vmatpush1.bf16.msra.mxu1 %v2202_v47  ;;  %967 = vmatprep.mubr.bf16.mxu1 %v1749_v13  ;;  %v2166_v35 = vld [vmem:[#allocation2 + $0x2c4] ss:$8 sps:$4 sm:$0xff]   ;;  %v2276_v42 = vld [vmem:[%s2780_s2 + $0x50] sm:$0xff]  }
  0x8b   :  { %945 = vmatprep.subr.bf16.mxu1 %v2206_v48  ;;  %v2275_v41 = vld [vmem:[%s2780_s2 + $0x8] sm:$0xff]   ;;  %v2277_v47 = vld [vmem:[%s2780_s2 + $0x10] sm:$0xff]   ;;  %v2278_v48 = vld [vmem:[%s2780_s2 + $0x58] sm:$0xff]  }
  0x8c   :  { %993 = vmatpush1.bf16.msra.mxu0 %v2103_v18  ;;  %v2149_v18 = vld [vmem:[#allocation2 + $0x270] ss:$8 sps:$4 sm:$0xff]   ;;  %v2235_v11 = vld [vmem:[#allocation2 + $0x394] ss:$8 sps:$4 sm:$0xff]   ;;  %v2241_v13 = vld [vmem:[#allocation2 + $0x3a4] ss:$8 sps:$4 sm:$0xff]  }
  0x8d   :  { %994 = vmatprep.subr.bf16.mxu0 %v2104_v19  ;;  %v2154_v19 = vld [vmem:[#allocation2 + $0x284] ss:$8 sps:$4 sm:$0xff]   ;;  %v2233_v12 = vld [vmem:[#allocation2 + $0x390] ss:$8 sps:$4 sm:$0xff]  }
  0x8e   :  { %946 = vmatpush1.bf16.msra.mxu1 %v2208_v53  ;;  %v2173_v53 = vld [vmem:[#allocation2 + $0x2f0] ss:$8 sps:$4 sm:$0xff]  }
  0x8f   :  { %947 = vmatprep.subr.bf16.mxu1 %v2212_v54  ;;  %v2181_v54 = vld [vmem:[#allocation2 + $0x304] ss:$8 sps:$4 sm:$0xff]  }
  0x90   :  { %995 = vmatpush1.bf16.msra.mxu0 %v2106_v20  ;;  %v2250_v20 = vld [vmem:[#allocation2 + $0xc0] ss:$8 sps:$4 sm:$0xff]  }
  0x91   :  { %996 = vmatprep.subr.bf16.mxu0 %v2107_v21  ;;  %v2254_v21 = vld [vmem:[#allocation2 + $0xd4] ss:$8 sps:$4 sm:$0xff]  }
  0x92   :  { %948 = vmatpush1.bf16.msra.mxu1 %v2214_v57  ;;  %v2281_v57 = vld [vmem:[%s2780_s2 + $0x20] sm:$0xff]  }
  0x93   :  { %949 = vmatprep.subr.bf16.mxu1 %v2218_v58  ;;  %v1752_v58 = vcombine.low %v2642_v45, %v2647_v46  ;;  %v2197_v45 = vld [vmem:[#allocation2 + $0x330] ss:$8 sps:$4 sm:$0xff]   ;;  %v2205_v46 = vld [vmem:[#allocation2 + $0x344] ss:$8 sps:$4 sm:$0xff]  }
  0x94   :  { %997 = vmatpush1.bf16.msra.mxu0 %v2109_v22  ;;  %v2152_v22 = vld [vmem:[#allocation2 + $0x280] ss:$8 sps:$4 sm:$0xff]  }
  0x95   :  { %998 = vmatprep.subr.bf16.mxu0 %v2110_v23  ;;  %v2157_v23 = vld [vmem:[#allocation2 + $0x294] ss:$8 sps:$4 sm:$0xff]  }
  0x96   :  { %950 = vmatpush1.bf16.msra.mxu1 %v2220_v61  ;;  %v2187_v61 = vld [vmem:[#allocation2 + $0x314] ss:$8 sps:$4 sm:$0xff]  }
  0x97   :  { %951 = vmatprep.subr.bf16.mxu1 %v2224_v62  ;;  %v2185_v62 = vld [vmem:[#allocation2 + $0x310] ss:$8 sps:$4 sm:$0xff]  }
  0x98   :  { %999 = vmatpush1.bf16.msra.mxu0 %v2112_v24  ;;  %v2256_v24 = vld [vmem:[#allocation2 + $0xd0] ss:$8 sps:$4 sm:$0xff]  }
  0x99   :  { %1000 = vmatprep.subr.bf16.mxu0 %v2113_v25  ;;  %v2155_v25 = vld [vmem:[#allocation2 + $0x290] ss:$8 sps:$4 sm:$0xff]  }
  0x9a   :  { %952 = vmatpush1.bf16.msra.mxu1 %v2226_v1  ;;  %v2199_v1 = vld [vmem:[#allocation2 + $0x334] ss:$8 sps:$4 sm:$0xff]  }
  0x9b   :  { %953 = vmatprep.subr.bf16.mxu1 %v2230_v2  ;;  %v2203_v2 = vld [vmem:[#allocation2 + $0x340] ss:$8 sps:$4 sm:$0xff]  }
  0x9c   :  { %1001 = vmatpush1.bf16.msra.mxu0 %v2115_v26  ;;  %v2260_v26 = vld [vmem:[#allocation2 + $0xe4] ss:$8 sps:$4 sm:$0xff]  }
  0x9d   :  { %1002 = vmatprep.subr.bf16.mxu0 %v2116_v27  ;;  %v2160_v27 = vld [vmem:[#allocation2 + $0x2a4] ss:$8 sps:$4 sm:$0xff]  }
  0x9e   :  { %954 = vmatpush1.bf16.msra.mxu1 %v2232_v5  ;;  %v2217_v5 = vld [vmem:[#allocation2 + $0x364] ss:$8 sps:$4 sm:$0xff]  }
  0x9f   :  { %955 = vmatprep.subr.bf16.mxu1 %v2236_v6  ;;  %v2215_v6 = vld [vmem:[#allocation2 + $0x360] ss:$8 sps:$4 sm:$0xff]  }
  0xa0   :  { %1003 = vmatpush1.bf16.msra.mxu0 %v2118_v30  ;;  %v2158_v30 = vld [vmem:[#allocation2 + $0x2a0] ss:$8 sps:$4 sm:$0xff]  }
  0xa1   :  { %1004 = vmatprep.subr.bf16.mxu0 %v2119_v33  ;;  %v2272_v33 = vld [vmem:[%s2780_s2 + $0x40] sm:$0xff]  }
  0xa2   :  { %956 = vmatpush1.bf16.msra.mxu1 %v2238_v9  ;;  %v2229_v9 = vld [vmem:[#allocation2 + $0x384] ss:$8 sps:$4 sm:$0xff]  }
  0xa3   :  { %957 = vmatprep.subr.bf16.mxu1 %v2242_v10  ;;  %v2227_v10 = vld [vmem:[#allocation2 + $0x380] ss:$8 sps:$4 sm:$0xff]  }
  0xa4   :  { %1005 = vmatpush1.bf16.msra.mxu0 %v2121_v34  ;;  %v2161_v34 = vld [vmem:[#allocation2 + $0x2b0] ss:$8 sps:$4 sm:$0xff]  }
  0xa5   :  { %1006 = vmatprep.subr.bf16.mxu0 %v2122_v36  ;;  %v2273_v36 = vld [vmem:[%s2780_s2] sm:$0xff]  }
  0xa6   :  { %958 = vmatpush1.bf16.msra.mxu1 %v2244_v16  ;;  %v2245_v16 = vld [vmem:[#allocation2 + $0x3b0] ss:$8 sps:$4 sm:$0xff]  }
  0xa7   :  { %959 = vmatprep.subr.bf16.mxu1 %v2248_v17  ;;  %v2253_v17 = vld [vmem:[#allocation2 + $0x3c4] ss:$8 sps:$4 sm:$0xff]  }
  0xa8   :  { %1007 = vmatpush1.bf16.msra.mxu0 %v2124_v39  ;;  %v2164_v39 = vld [vmem:[#allocation2 + $0x2c0] ss:$8 sps:$4 sm:$0xff]  }
  0xa9   :  { %1008 = vmatprep.subr.bf16.mxu0 %v2125_v40  ;;  %v2169_v40 = vld [vmem:[#allocation2 + $0x2d4] ss:$8 sps:$4 sm:$0xff]  }
  0xaa   :  { %960 = vmatpush1.bf16.msra.mxu1 %v2250_v20  ;;  %v2257_v20 = vld [vmem:[#allocation2 + $0x3d0] ss:$8 sps:$4 sm:$0xff]  }
  0xab   :  { %961 = vmatprep.subr.bf16.mxu1 %v2254_v21  ;;  %v2265_v21 = vld [vmem:[#allocation2 + $0x3e4] ss:$8 sps:$4 sm:$0xff]  }
  0xac   :  { %1009 = vmatpush1.bf16.msra.mxu0 %v2127_v43  ;;  %v2167_v43 = vld [vmem:[#allocation2 + $0x2d0] ss:$8 sps:$4 sm:$0xff]  }
  0xad   :  { %1021 = vmatprep.subr.bf16.mxu0 %v2130_v44  ;;  %v2172_v44 = vld [vmem:[#allocation2 + $0x2e4] ss:$8 sps:$4 sm:$0xff]  }
  0xae   :  { %962 = vmatpush1.bf16.msra.mxu1 %v2256_v24  ;;  %v2269_v24 = vld [vmem:[#allocation2 + $0x3f0] ss:$8 sps:$4 sm:$0xff]  }
  0xaf   :  { %1011 = vmatmul.mubr.bf16.vlgmr.msra.gmra.mrb[0].mxu0 %v1750_v49  ;;  %963 = vmatprep.subr.bf16.mxu1 %v2260_v26  ;;  %v2170_v49 = vld [vmem:[#allocation2 + $0x2e0] ss:$8 sps:$4 sm:$0xff]  }
  0xb0   :  { %1022 = vmatpush1.bf16.msra.mxu0 %v2128_v50  ;;  %1053 = vmatprep.mubr.bf16.mxu0 %v1753_v52  ;;  %v2175_v50 = vld [vmem:[#allocation2 + $0x2f4] ss:$8 sps:$4 sm:$0xff]   ;;  %v2280_v52 = vld [vmem:[%s2780_s2 + $0x60] sm:$0xff]   ;;  %v2282_v26 = vld [vmem:[%s2780_s2 + $0x68] sm:$0xff]  }
  0xb1   :  { %1023 = vmatprep.subr.bf16.mxu0 %v2133_v51  ;;  %v2279_v51 = vld [vmem:[%s2780_s2 + $0x18] sm:$0xff]  }
  0xb2   :  { %964 = vmatpush1.bf16.msra.mxu1 %v2262_v28  ;;  %v2284_v28 = vld [vmem:[%s2780_s2 + $0x70] sm:$0xff]  }
  0xb3   :  { %965 = vmatprep.subr.bf16.mxu1 %v2266_v29  ;;  %v2285_v29 = vld [vmem:[%s2780_s2 + $0x30] sm:$0xff]  }
  0xb4   :  { %1024 = vmatpush1.bf16.msra.mxu0 %v2131_v55  ;;  %v2689_v55 = vld [vmem:[%s2778_s0 + $0x18] sm:$0xff] }
  0xb5   :  { %1025 = vmatprep.subr.bf16.mxu0 %v2136_v56  ;;  %v2694_v56 = vld [vmem:[%s2778_s0 + $0x38] sm:$0xff] }
  0xb6   :  { %966 = vmatpush1.bf16.msra.mxu1 %v2268_v32  ;;  %v2479_v32 = vmov 0.0  }
  0xb7   :  { %1947 = vmatprep.subr.bf16.mxu1 %v2272_v33 }
  0xb8   :  { %1026 = vmatpush1.bf16.msra.mxu0 %v2134_v59  ;;  %v2179_v59 = vld [vmem:[#allocation2 + $0x300] ss:$8 sps:$4 sm:$0xff]  }
  0xb9   :  { %1027 = vmatprep.subr.bf16.mxu0 %v2139_v60  ;;  %968 = vmatmul.mubr.bf16.vlgmr.msra.gmra.mrb[0].mxu1 %v1748_v37  ;;  %v1755_v60 = vcombine.high %v2689_v55, %v2694_v56 }
  0xba   :  { %1948 = vmatpush3.bf16.msra.mxu1 %v2273_v36 }
  0xbb   :  { %1949 = vmatprep.subr.bf16.mxu1 %v2274_v38 }
  0xbc   :  { %1028 = vmatpush1.bf16.msra.mxu0 %v2137_v63  ;;  %v2193_v63 = vld [vmem:[#allocation2 + $0x324] ss:$8 sps:$4 sm:$0xff]  }
  0xbd   :  { %1029 = vmatprep.subr.bf16.mxu0 %v2142_v0  ;;  %v2191_v0 = vld [vmem:[#allocation2 + $0x320] ss:$8 sps:$4 sm:$0xff]  }
  0xbe   :  { %1950 = vmatpush3.bf16.msra.mxu1 %v2275_v41 }
  0xbf   :  { %1951 = vmatprep.subr.bf16.mxu1 %v2276_v42 }
  0xc0   :  { %1030 = vmatpush1.bf16.msra.mxu0 %v2140_v3  ;;  %v2211_v3 = vld [vmem:[#allocation2 + $0x354] ss:$8 sps:$4 sm:$0xff]  }
  0xc1   :  { %1031 = vmatprep.subr.bf16.mxu0 %v2145_v4  ;;  %v2209_v4 = vld [vmem:[#allocation2 + $0x350] ss:$8 sps:$4 sm:$0xff]  }
  0xc2   :  { %1952 = vmatpush3.bf16.msra.mxu1 %v2277_v47 }
  0xc3   :  { %1953 = vmatprep.subr.bf16.mxu1 %v2278_v48 }
  0xc4   :  { %1032 = vmatpush1.bf16.msra.mxu0 %v2143_v7  ;;  %v2223_v7 = vld [vmem:[#allocation2 + $0x374] ss:$8 sps:$4 sm:$0xff]  }
  0xc5   :  { %1033 = vmatprep.subr.bf16.mxu0 %v2148_v8  ;;  %v2221_v8 = vld [vmem:[#allocation2 + $0x370] ss:$8 sps:$4 sm:$0xff]  }
  0xc6   :  { %1954 = vmatpush3.bf16.msra.mxu1 %v2279_v51  ;;  %v2290_v51 = vld [vmem:[#allocation4 + $0x10] sm:$0xff]  }
  0xc7   :  { %1955 = vmatprep.subr.bf16.mxu1 %v2280_v52  ;;  %v2291_v52 = vld [vmem:[#allocation4 + $0x18] sm:$0xff]  }
  0xc8   :  { %1034 = vmatpush1.bf16.msra.mxu0 %v2146_v14  ;;  %v2239_v14 = vld [vmem:[#allocation2 + $0x3a0] ss:$8 sps:$4 sm:$0xff]  }
  0xc9   :  { %1035 = vmatprep.subr.bf16.mxu0 %v2151_v15  ;;  %v2247_v15 = vld [vmem:[#allocation2 + $0x3b4] ss:$8 sps:$4 sm:$0xff]  }
  0xca   :  { %1956 = vmatpush3.bf16.msra.mxu1 %v2281_v57 }
  0xcb   :  { %1957 = vmatprep.subr.bf16.mxu1 %v2282_v26 }
  0xcc   :  { %1036 = vmatpush1.bf16.msra.mxu0 %v2149_v18  ;;  %v2251_v18 = vld [vmem:[#allocation2 + $0x3c0] ss:$8 sps:$4 sm:$0xff]  }
  0xcd   :  { %1037 = vmatprep.subr.bf16.mxu0 %v2154_v19  ;;  %v2259_v19 = vld [vmem:[#allocation2 + $0x3d4] ss:$8 sps:$4 sm:$0xff]  }
  0xd0   :  { %1038 = vmatpush1.bf16.msra.mxu0 %v2152_v22  ;;  %v2263_v22 = vld [vmem:[#allocation2 + $0x3e0] ss:$8 sps:$4 sm:$0xff]  }
  0xd1   :  { %1039 = vmatprep.subr.bf16.mxu0 %v2157_v23  ;;  %v2271_v23 = vld [vmem:[#allocation2 + $0x3f4] ss:$8 sps:$4 sm:$0xff]  }
  0xd4   :  { %1040 = vmatpush1.bf16.msra.mxu0 %v2155_v25  ;;  %v1754_v25 = vcombine.low %v2689_v55, %v2694_v56  ;;  %v2294_v55 = vld [vmem:[#allocation4 + $0x30] sm:$0xff]   ;;  %v2295_v56 = vld [vmem:[#allocation4 + $0x38] sm:$0xff]  }
  0xd5   :  { %1041 = vmatprep.subr.bf16.mxu0 %v2160_v27  ;;  %v2283_v27 = vld [vmem:[%s2780_s2 + $0x28] sm:$0xff]  }
  0xd6   :  { %1958 = vmatpush3.bf16.msra.mxu1 %v2283_v27 }
  0xd7   :  { %1959 = vmatprep.subr.bf16.mxu1 %v2284_v28 }
  0xd8   :  { %1042 = vmatpush1.bf16.msra.mxu0 %v2158_v30  ;;  %v2286_v30 = vld [vmem:[%s2780_s2 + $0x78] sm:$0xff]  }
  0xd9   :  { %1043 = vmatprep.subr.bf16.mxu0 %v2163_v31  ;;  %v2287_v31 = vld [vmem:[%s2780_s2 + $0x38] sm:$0xff]  }
  0xda   :  { %1960 = vmatpush3.bf16.msra.mxu1 %v2285_v29 }
  0xdb   :  { %1961 = vmatprep.subr.bf16.mxu1 %v2286_v30 }
  0xdc   :  { %1044 = vmatpush1.bf16.msra.mxu0 %v2161_v34 }
  0xdd   :  { %1045 = vmatprep.subr.bf16.mxu0 %v2166_v35 }
  0xde   :  { %1962 = vmatpush3.bf16.msra.mxu1 %v2287_v31 }
  0xdf   :  { %1996 = vmatprep.subr.bf16.mxu1 %v2479_v32 }
  0xe0   :  { %1046 = vmatpush1.bf16.msra.mxu0 %v2164_v39 }
  0xe1   :  { %1047 = vmatprep.subr.bf16.mxu0 %v2169_v40 }
  0xe4   :  { %1048 = vmatpush1.bf16.msra.mxu0 %v2167_v43 }
  0xe5   :  { %1049 = vmatprep.subr.bf16.mxu0 %v2172_v44 }
  0xe8   :  { %1050 = vmatpush1.bf16.msra.mxu0 %v2170_v49  ;;  %v2288_v49 = vld [vmem:[#allocation4] sm:$0xff]  }
  0xe9   :  { %1051 = vmatprep.subr.bf16.mxu0 %v2175_v50  ;;  %v2289_v50 = vld [vmem:[#allocation4 + $0x8] sm:$0xff]  }
  0xec   :  { %1052 = vmatpush1.bf16.msra.mxu0 %v2173_v53  ;;  %v2292_v53 = vld [vmem:[#allocation4 + $0x20] sm:$0xff]  }
  0xed   :  { %1064 = vmatprep.subr.bf16.mxu0 %v2181_v54  ;;  %v2293_v54 = vld [vmem:[#allocation4 + $0x28] sm:$0xff]  }
  0xef   :  { %1054 = vmatmul.mubr.bf16.vlgmr.msra.gmra.mrb[0].mxu0 %v1752_v58 }
  0xf0   :  { %1065 = vmatpush1.bf16.msra.mxu0 %v2179_v59  ;;  %1096 = vmatprep.mubr.bf16.mxu0 %v1755_v60 }
  0xf1   :  { %1066 = vmatprep.subr.bf16.mxu0 %v2187_v61 }
  0xf4   :  { %1067 = vmatpush1.bf16.msra.mxu0 %v2185_v62 }
  0xf5   :  { %1068 = vmatprep.subr.bf16.mxu0 %v2193_v63 }
  0xf8   :  { %1069 = vmatpush1.bf16.msra.mxu0 %v2191_v0 }
  0xf9   :  { %1070 = vmatprep.subr.bf16.mxu0 %v2199_v1 }
  0xfc   :  { %1071 = vmatpush1.bf16.msra.mxu0 %v2197_v45 }
  0xfd   :  { %1072 = vmatprep.subr.bf16.mxu0 %v2205_v46 }
 0x100   :  { %1073 = vmatpush1.bf16.msra.mxu0 %v2203_v2 }
 0x101   :  { %1074 = vmatprep.subr.bf16.mxu0 %v2211_v3 }
 0x104   :  { %1075 = vmatpush1.bf16.msra.mxu0 %v2209_v4 }
 0x105   :  { %1076 = vmatprep.subr.bf16.mxu0 %v2217_v5 }
 0x108   :  { %1077 = vmatpush1.bf16.msra.mxu0 %v2215_v6 }
 0x109   :  { %1078 = vmatprep.subr.bf16.mxu0 %v2223_v7  ;;  %v2296_v7 = vld [vmem:[#allocation6] sm:$0xff]  }
 0x10c   :  { %1079 = vmatpush1.bf16.msra.mxu0 %v2221_v8 }
 0x10d   :  { %1080 = vmatprep.subr.bf16.mxu0 %v2229_v9  ;;  %v2297_v9 = vld [vmem:[#allocation6 + $0x8] sm:$0xff]  }
 0x110   :  { %1081 = vmatpush1.bf16.msra.mxu0 %v2227_v10  ;;  %v2298_v10 = vld [vmem:[#allocation6 + $0x10] sm:$0xff]  }
 0x111   :  { %1082 = vmatprep.subr.bf16.mxu0 %v2235_v11  ;;  %v2299_v11 = vld [vmem:[#allocation6 + $0x18] sm:$0xff]  }
 0x114   :  { %1083 = vmatpush1.bf16.msra.mxu0 %v2233_v12  ;;  %v2300_v12 = vld [vmem:[#allocation6 + $0x20] sm:$0xff]  }
 0x115   :  { %1084 = vmatprep.subr.bf16.mxu0 %v2241_v13  ;;  %v2301_v13 = vld [vmem:[#allocation6 + $0x28] sm:$0xff]  }
 0x118   :  { %1085 = vmatpush1.bf16.msra.mxu0 %v2239_v14  ;;  %v2302_v14 = vld [vmem:[#allocation6 + $0x30] sm:$0xff]  }
 0x119   :  { %1086 = vmatprep.subr.bf16.mxu0 %v2247_v15  ;;  %v2303_v15 = vld [vmem:[#allocation6 + $0x38] sm:$0xff]  }
 0x11c   :  { %1087 = vmatpush1.bf16.msra.mxu0 %v2245_v16  ;;  %v2304_v16 = vld [vmem:[%s2784_s6] sm:$0xff]  }
 0x11d   :  { %1088 = vmatprep.subr.bf16.mxu0 %v2253_v17  ;;  %v2305_v17 = vld [vmem:[#allocation7] sm:$0xff]  }
 0x120   :  { %1089 = vmatpush1.bf16.msra.mxu0 %v2251_v18  ;;  %v2306_v18 = vld [vmem:[#allocation7 + $0x8] sm:$0xff]  }
 0x121   :  { %1090 = vmatprep.subr.bf16.mxu0 %v2259_v19  ;;  %v2307_v19 = vld [vmem:[#allocation7 + $0x10] sm:$0xff]  }
 0x124   :  { %1091 = vmatpush1.bf16.msra.mxu0 %v2257_v20  ;;  %v2308_v20 = vld [vmem:[#allocation7 + $0x18] sm:$0xff]  }
 0x125   :  { %1092 = vmatprep.subr.bf16.mxu0 %v2265_v21  ;;  %v2309_v21 = vld [vmem:[#allocation7 + $0x20] sm:$0xff]  }
 0x128   :  { %1093 = vmatpush1.bf16.msra.mxu0 %v2263_v22  ;;  %v2310_v22 = vld [vmem:[#allocation7 + $0x28] sm:$0xff]  }
 0x129   :  { %1094 = vmatprep.subr.bf16.mxu0 %v2271_v23  ;;  %v2311_v23 = vld [vmem:[#allocation7 + $0x30] sm:$0xff]  }
 0x12c   :  { %1095 = vmatpush1.bf16.msra.mxu0 %v2269_v24  ;;  %v2312_v24 = vld [vmem:[#allocation7 + $0x38] sm:$0xff]  }
 0x12f   :  { %1097 = vmatmul.mubr.bf16.vlgmr.msra.gmra.mrb[0].mxu0 %v1754_v25 }
 0x18c   :  { %v969_v33 = vpop.f32.mrb[0].mxu1 }
 0x18d   :  { %v971_v34 = vpop.f32.mrb[1].mxu1 }
 0x18e   :  { %v973_v35 = vpop.f32.mrb[2].mxu1 }
 0x18f   :  { %v975_v36 = vpop.f32.mrb[3].mxu1 }
 0x202   :  { %v1098_v37 = vpop.f32.mrb[0].mxu0 }
 0x203   :  { %v2056_v38 = vadd.f32 %v1098_v37, %v969_v33  ;;  %v1100_v39 = vpop.f32.mrb[1].mxu0 }
 0x204   :  { %v2057_v40 = vadd.f32 %v1100_v39, %v971_v34  ;;  %v1102_v41 = vpop.f32.mrb[2].mxu0 }
 0x205   :  { %v2058_v42 = vadd.f32 %v1102_v41, %v973_v35  ;;  %v1104_v43 = vpop.f32.mrb[3].mxu0 }
 0x206   :  { %v2059_v44 = vadd.f32 %v1104_v43, %v975_v36 }
 0x207   :  { %v1107_v47 = vpack.c.bf16 %v2058_v42, %v2056_v38 }
 0x208   :  { %v1108_v48 = vpack.c.bf16 %v2059_v44, %v2057_v40 }
 0x20a   :  { %1287 = vmatprep.mubr.bf16.mxu1 %v1108_v48 }
 0x20b   :  { %1288 = vmatmul.mubr.bf16.vlgmr.msra.gmra.mrb[4].mxu1 %v1107_v47 }
 0x20c   :  { %1997 = vmatpush3.bf16.msra.mxu1 %v2288_v49  ;;  %2012 = vmatprep.mubr.msk.bf16.mxu1 %vm2480_vm0, %v2479_v32 }
 0x20d   :  { %1998 = vmatprep.subr.bf16.mxu1 %v2479_v32 }
 0x210   :  { %1999 = vmatpush3.bf16.msra.mxu1 %v2289_v50 }
 0x211   :  { %2000 = vmatprep.subr.bf16.mxu1 %v2479_v32 }
 0x214   :  { %2001 = vmatpush3.bf16.msra.mxu1 %v2290_v51 }
 0x215   :  { %2002 = vmatprep.subr.bf16.mxu1 %v2479_v32 }
 0x218   :  { %2003 = vmatpush3.bf16.msra.mxu1 %v2291_v52 }
 0x219   :  { %2004 = vmatprep.subr.bf16.mxu1 %v2479_v32 }
 0x21c   :  { %2005 = vmatpush3.bf16.msra.mxu1 %v2292_v53 }
 0x21d   :  { %2006 = vmatprep.subr.bf16.mxu1 %v2479_v32 }
 0x220   :  { %2007 = vmatpush3.bf16.msra.mxu1 %v2293_v54 }
 0x221   :  { %2008 = vmatprep.subr.bf16.mxu1 %v2479_v32 }
 0x224   :  { %2009 = vmatpush3.bf16.msra.mxu1 %v2294_v55 }
 0x225   :  { %2010 = vmatprep.subr.bf16.mxu1 %v2479_v32 }
 0x228   :  { %2011 = vmatpush3.bf16.msra.mxu1 %v2295_v56 }
 0x229   :  { %2016 = vmatprep.subr.bf16.mxu1 %v2479_v32 }
 0x2de   :  { %v1963_v57 = vpop.f32.mrb[4].mxu1 }
 0x2df   :  { %v1964_v58 = vpop.f32.mrb[5].mxu1 }
 0x2e0   :  { %v2734_v59 = vadd.f32 %v1964_v58, %v1963_v57  ;;  %v1966_v60 = vpop.f32.mrb[6].mxu1 }
 0x2e1   :  { %v1967_v61 = vpop.f32.mrb[7].mxu1 }
 0x2e2   :  { %v1298_v62 = vmul.f32 0.70710677, %v2734_v59  ;;  %v2737_v63 = vadd.f32 %v1967_v61, %v1966_v60  ;;  %v1296_v2 = vmul.f32 0.5, %v2734_v59 }
 0x2e4   :  { %2313 = verf.f32 %v1298_v62  ;;  %v1299_v0 = vmul.f32 0.70710677, %v2737_v63  ;;  %v1297_v3 = vmul.f32 0.5, %v2737_v63 }
 0x2e6   :  { %2315 = verf.f32 %v1299_v0 }
 0x2ee   :  { %v2314_v1 = vpop.eup %2313 }
 0x2ef   :  { %v1302_v45 = vadd.f32 1.0, %v2314_v1 }
 0x2f0   :  { %v2316_v46 = vpop.eup %2315 }
 0x2f1   :  { %v1303_v4 = vadd.f32 1.0, %v2316_v46  ;;  %v1304_v5 = vmul.f32 %v1302_v45, %v1296_v2  ;;  %v1908_v45 = vld [vmem:[%s2782_s4] ss:$0 sm:$0xff] }
 0x2f3   :  { %v1305_v6 = vmul.f32 %v1303_v4, %v1297_v3 }
 0x2f5   :  { %v1306_v8 = vpack.c.bf16 %v1305_v6, %v1304_v5  ;;  %v1909_v6 = vld [vmem:[%s2783_s5] ss:$0 sm:$0xff] }
 0x2f7   :  { %2013 = vmatmul.mubr.bf16.vlgmr.msra.gmra.mrb[8].mxu1 %v1306_v8 }
 0x2f8   :  { %2017 = vmatpush3.bf16.msra.mxu1 %v2296_v7  ;;  %2032 = vmatprep.mubr.msk.bf16.mxu1 %vm2480_vm0, %v2479_v32 }
 0x2f9   :  { %2018 = vmatprep.subr.bf16.mxu1 %v2479_v32 }
 0x2fc   :  { %2019 = vmatpush3.bf16.msra.mxu1 %v2297_v9 }
 0x2fd   :  { %2020 = vmatprep.subr.bf16.mxu1 %v2479_v32 }
 0x300   :  { %2021 = vmatpush3.bf16.msra.mxu1 %v2298_v10 }
 0x301   :  { %2022 = vmatprep.subr.bf16.mxu1 %v2479_v32 }
 0x304   :  { %2023 = vmatpush3.bf16.msra.mxu1 %v2299_v11 }
 0x305   :  { %2024 = vmatprep.subr.bf16.mxu1 %v2479_v32 }
 0x308   :  { %2025 = vmatpush3.bf16.msra.mxu1 %v2300_v12 }
 0x309   :  { %2026 = vmatprep.subr.bf16.mxu1 %v2479_v32 }
 0x30c   :  { %2027 = vmatpush3.bf16.msra.mxu1 %v2301_v13 }
 0x30d   :  { %2028 = vmatprep.subr.bf16.mxu1 %v2479_v32 }
 0x310   :  { %2029 = vmatpush3.bf16.msra.mxu1 %v2302_v14 }
 0x311   :  { %2030 = vmatprep.subr.bf16.mxu1 %v2479_v32 }
 0x314   :  { %2031 = vmatpush3.bf16.msra.mxu1 %v2303_v15 }
 0x315   :  { %2036 = vmatprep.subr.bf16.mxu1 %v2479_v32 }
 0x317   :  { %2033 = vmatmul.mubr.bf16.vlgmr.msra.gmra.mrb[12].mxu1 %v2304_v16 }
 0x318   :  { %2052 = vmatprep.mubr.msk.bf16.mxu1 %vm2480_vm0, %v2479_v32  ;;  %2037 = vmatpush3.bf16.msra.mxu1 %v2305_v17 }
 0x319   :  { %2038 = vmatprep.subr.bf16.mxu1 %v2479_v32 }
 0x31c   :  { %2039 = vmatpush3.bf16.msra.mxu1 %v2306_v18 }
 0x31d   :  { %2040 = vmatprep.subr.bf16.mxu1 %v2479_v32 }
 0x320   :  { %2041 = vmatpush3.bf16.msra.mxu1 %v2307_v19 }
 0x321   :  { %2042 = vmatprep.subr.bf16.mxu1 %v2479_v32 }
 0x324   :  { %2043 = vmatpush3.bf16.msra.mxu1 %v2308_v20 }
 0x325   :  { %2044 = vmatprep.subr.bf16.mxu1 %v2479_v32 }
 0x328   :  { %2045 = vmatpush3.bf16.msra.mxu1 %v2309_v21 }
 0x329   :  { %2046 = vmatprep.subr.bf16.mxu1 %v2479_v32 }
 0x32c   :  { %2047 = vmatpush3.bf16.msra.mxu1 %v2310_v22 }
 0x32d   :  { %2048 = vmatprep.subr.bf16.mxu1 %v2479_v32 }
 0x330   :  { %2049 = vmatpush3.bf16.msra.mxu1 %v2311_v23 }
 0x331   :  { %2050 = vmatprep.subr.bf16.mxu1 %v2479_v32 }
 0x334   :  { %2051 = vmatpush3.bf16.msra.mxu1 %v2312_v24 }
 0x3ca   :  { %v1389_v25 = vpop.f32.mrb[8].mxu1 }
 0x3cb   :  { %v1396_v26 = vadd.f32 %v2734_v59, %v1389_v25  ;;  %v2014_v27 = vpop.f32.mrb[9].mxu1 }
 0x3cc   :  { %v1392_v28 = vpop.f32.mrb[10].mxu1 }
 0x3cd   :  { %v1397_v29 = vadd.f32 %v2737_v63, %v1392_v28  ;;  %1398 = vadd.xlane.f32.xlu0 %v1396_v26  ;;  %v2015_v30 = vpop.f32.mrb[11].mxu1  ;;  %v1405_v33 = vmul.f32 %v1396_v26, %v1396_v26 }
 0x3cf   :  { %v1406_v31 = vmul.f32 %v1397_v29, %v1397_v29 }
 0x3d1   :  { %1400 = vadd.xlane.f32.xlu0 %v1397_v29  ;;  %1409 = vadd.xlane.f32.xlu1 %v1406_v31 }
 0x3d5   :  { %1407 = vadd.xlane.f32.xlu0 %v1405_v33 }
 0x3ea   :  { %v1575_v34 = vpop.f32.mrb[12].mxu1 }
 0x3eb   :  { %v1584_v35 = vmul.f32 0.70710677, %v1575_v34  ;;  %v2034_v36 = vpop.f32.mrb[13].mxu1  ;;  %v1582_v42 = vmul.f32 0.5, %v1575_v34 }
 0x3ec   :  { %v1578_v32 = vpop.f32.mrb[14].mxu1 }
 0x3ed   :  { %2317 = verf.f32 %v1584_v35  ;;  %v1585_v37 = vmul.f32 0.70710677, %v1578_v32  ;;  %v2035_v38 = vpop.f32.mrb[15].mxu1  ;;  %v1583_v43 = vmul.f32 0.5, %v1578_v32 }
 0x3ef   :  { %2319 = verf.f32 %v1585_v37 }
 0x3f7   :  { %v2318_v39 = vpop.eup %2317 }
 0x3f8   :  { %v1588_v40 = vadd.f32 1.0, %v2318_v39 }
 0x3f9   :  { %v2320_v41 = vpop.eup %2319 }
 0x3fa   :  { %v1589_v44 = vadd.f32 1.0, %v2320_v41  ;;  %v1590_v47 = vmul.f32 %v1588_v40, %v1582_v42  ;;  %v1930_v41 = vld [vmem:[#allocation10] ss:$0 sm:$0xff] }
 0x3fc   :  { %v1591_v48 = vmul.f32 %v1589_v44, %v1583_v43 }
 0x3fe   :  { %v1592_v49 = vpack.c.bf16 %v1591_v48, %v1590_v47 }
 0x400   :  { %2053 = vmatmul.mubr.bf16.vlgmr.msra.gmra.mrb[16].mxu1 %v1592_v49 }
 0x45a   :  { %v1399_v50 = vpop.xlane.xlu0 %1398 }
 0x45b   :  { %v1403_v53 = vmul.f32 0.0078125, %v1399_v50 }
 0x45d   :  { %v1413_v58 = vmul.f32 %v1403_v53, %v1403_v53  ;;  %v1417_v46 = vsub.f32 %v1396_v26, %v1403_v53 }
 0x45e   :  { %v1401_v51 = vpop.xlane.xlu0 %1400  ;;  %v1410_v52 = vpop.xlane.xlu1 %1409 }
 0x45f   :  { %v1404_v54 = vmul.f32 0.0078125, %v1401_v51  ;;  %v1412_v56 = vmul.f32 0.0078125, %v1410_v52 }
 0x461   :  { %v1414_v55 = vmul.f32 %v1404_v54, %v1404_v54  ;;  %v1418_v0 = vsub.f32 %v1397_v29, %v1404_v54 }
 0x462   :  { %v1408_v57 = vpop.xlane.xlu0 %1407 }
 0x463   :  { %v1416_v59 = vsub.f32 %v1412_v56, %v1414_v55  ;;  %v1411_v60 = vmul.f32 0.0078125, %v1408_v57 }
 0x465   :  { %v1420_v61 = vadd.f32 1e-05, %v1416_v59  ;;  %v1415_v62 = vsub.f32 %v1411_v60, %v1413_v58 }
 0x467   :  { %2321 = vrsqrt.f32 %v1420_v61  ;;  %v1419_v63 = vadd.f32 1e-05, %v1415_v62 }
 0x469   :  { %2323 = vrsqrt.f32 %v1419_v63 }
 0x471   :  { %v2322_v1 = vpop.eup %2321 }
 0x472   :  { %v1424_v2 = vmul.f32 %v2322_v1, %v1418_v0 }
 0x473   :  { %v2324_v3 = vpop.eup %2323 }
 0x474   :  { %v1432_v4 = vmul.f32 %v1908_v45, %v1424_v2  ;;  %v1423_v5 = vmul.f32 %v2324_v3, %v1417_v46 }
 0x476   :  { %v1431_v7 = vmul.f32 %v1908_v45, %v1423_v5  ;;  %v1440_v8 = vadd.f32 %v1909_v6, %v1432_v4 }
 0x478   :  { %v1439_v9 = vadd.f32 %v1909_v6, %v1431_v7 }
 0x47a   :  { %v1940_v10 = vpack.c.bf16 %v1440_v8, %v1439_v9 }
 0x47c   :  { %1941 = vst [vmem:[%s2789_s11] sm:$0xff] %v1940_v10  }
 0x4d3   :  { %v1675_v11 = vpop.f32.mrb[16].mxu1 }
 0x4d4   :  { %v1682_v12 = vadd.f32 %v1675_v11, %v1575_v34  ;;  %v2054_v13 = vpop.f32.mrb[17].mxu1 }
 0x4d5   :  { %v1678_v14 = vpop.f32.mrb[18].mxu1 }
 0x4d6   :  { %v1683_v15 = vadd.f32 %v1678_v14, %v1578_v32  ;;  %1684 = vadd.xlane.f32.xlu1 %v1682_v12  ;;  %v2055_v16 = vpop.f32.mrb[19].mxu1  ;;  %v1690_v17 = vmul.f32 %v1682_v12, %v1682_v12  ;;  %v1929_v32 = vld [vmem:[#allocation9] ss:$0 sm:$0xff] }
 0x4d8   :  { %1692 = vadd.xlane.f32.xlu0 %v1690_v17  ;;  %v1691_v18 = vmul.f32 %v1683_v15, %v1683_v15 }
 0x4da   :  { %1686 = vadd.xlane.f32.xlu1 %v1683_v15 }
 0x4de   :  { %1694 = vadd.xlane.f32.xlu1 %v1691_v18 }
 0x563   :  { %v1685_v19 = vpop.xlane.xlu1 %1684 }
 0x564   :  { %v1688_v20 = vmul.f32 0.0078125, %v1685_v19 }
 0x565   :  { %v1693_v21 = vpop.xlane.xlu0 %1692 }
 0x566   :  { %v1698_v22 = vmul.f32 %v1688_v20, %v1688_v20  ;;  %v1696_v23 = vmul.f32 0.0078125, %v1693_v21  ;;  %v1702_v35 = vsub.f32 %v1682_v12, %v1688_v20 }
 0x567   :  { %v1687_v24 = vpop.xlane.xlu1 %1686 }
 0x568   :  { %v1700_v25 = vsub.f32 %v1696_v23, %v1698_v22  ;;  %v1689_v26 = vmul.f32 0.0078125, %v1687_v24 }
 0x56a   :  { %v1704_v27 = vadd.f32 1e-05, %v1700_v25  ;;  %v1699_v29 = vmul.f32 %v1689_v26, %v1689_v26  ;;  %v1703_v37 = vsub.f32 %v1683_v15, %v1689_v26 }
 0x56b   :  { %v1695_v28 = vpop.xlane.xlu1 %1694 }
 0x56c   :  { %2325 = vrsqrt.f32 %v1704_v27  ;;  %v1697_v30 = vmul.f32 0.0078125, %v1695_v28 }
 0x56e   :  { %v1701_v31 = vsub.f32 %v1697_v30, %v1699_v29 }
 0x570   :  { %v1705_v33 = vadd.f32 1e-05, %v1701_v31 }
 0x572   :  { %2327 = vrsqrt.f32 %v1705_v33 }
 0x576   :  { %v2326_v34 = vpop.eup %2325 }
 0x577   :  { %v1708_v36 = vmul.f32 %v2326_v34, %v1702_v35 }
 0x579   :  { %v1716_v39 = vmul.f32 %v1929_v32, %v1708_v36 }
 0x57b   :  { %v1724_v43 = vadd.f32 %v1930_v41, %v1716_v39 }
 0x57c   :  { %v2328_v38 = vpop.eup %2327 }
 0x57d   :  { %v1709_v40 = vmul.f32 %v2328_v38, %v1703_v37 }
 0x57f   :  { %v1717_v42 = vmul.f32 %v1929_v32, %v1709_v40 }
 0x581   :  { %v1725_v44 = vadd.f32 %v1930_v41, %v1717_v42 }
 0x583   :  { %v1945_v47 = vpack.c.bf16 %v1725_v44, %v1724_v43 }
 0x585   :  { %1946 = vst [vmem:[%s2790_s12] sm:$0xff] %v1945_v47  }
 0x586   :  { %1744 = vsyncpa [#allocation3], 1 }
 0x587   :  { %1745 = vsyncpa [#allocation5], 1 }
 0x588   :  { %1746 = vsyncpa [#allocation8], 1 }
 0x589   :  { %1747 = vsyncpa [#allocation11], 1 }

</bundles_post_ra>
